<compile_context>
chip_gen: v6e
topology: v6e:2x2x1
jax: 0.10.0
libtpu: 0.0.40
codegen_flags: <defaults>
</compile_context>

<pallas_src>
import functools
import math

import jax
import jax.numpy as jnp
from jax.experimental import pallas as pl
from jax.experimental.pallas import tpu as pltpu


# --------------------------------------------------------------------------- helpers
def _row_tile_for(n_rows, max_tile=1024):
    """Pick a sublane-aligned row tile: big tiles, but >=2 grid steps (megacore) when possible."""
    if n_rows <= 16:
        return max(8, ((n_rows + 7) // 8) * 8)
    half = (((n_rows + 1) // 2) + 7) // 8 * 8
    return min(max_tile, half)


def _pad_rows(a, n_pad):
    n = a.shape[0]
    if n_pad == n:
        return a
    return jnp.pad(a, ((0, n_pad - n), (0, 0)))


# --------------------------------------------------------------------------- kernel 1: fused QK/V projection
def _proj_kernel(x_ref, w_ref, b_ref, o_ref):
    acc = jnp.dot(x_ref[...], w_ref[...], preferred_element_type=jnp.float32)
    o_ref[...] = (acc + b_ref[...]).astype(o_ref.dtype)


def _linear(x, w_t, b, *, row_tile=None):
    """x: (N, Din); w_t: (Din, Dout); b: (Dout,). Returns x @ w_t + b, shape (N, Dout)."""
    n, d_in = x.shape
    d_out = w_t.shape[1]
    if row_tile is None:
        row_tile = _row_tile_for(n)
    n_pad = -(-n // row_tile) * row_tile
    x_p = _pad_rows(x, n_pad)
    b2 = b.reshape(1, d_out)

    out = pl.pallas_call(
        _proj_kernel,
        out_shape=jax.ShapeDtypeStruct((n_pad, d_out), x.dtype),
        grid_spec=pltpu.PrefetchScalarGridSpec(
            num_scalar_prefetch=0,
            grid=(n_pad // row_tile,),
            in_specs=[
                pl.BlockSpec((row_tile, d_in), lambda i: (i, 0)),
                pl.BlockSpec((d_in, d_out), lambda i: (0, 0)),
                pl.BlockSpec((1, d_out), lambda i: (0, 0)),
            ],
            out_specs=pl.BlockSpec((row_tile, d_out), lambda i: (i, 0)),
        ),
        compiler_params=pltpu.CompilerParams(dimension_semantics=("parallel",)),
    )(x_p, w_t, b2)
    return out[:n]


# --------------------------------------------------------------------------- kernel 2: multi-head SDPA
def _mha_kernel(q_ref, k_ref, v_ref, o_ref, *, num_heads, scale):
    dh = q_ref.shape[-1] // num_heads
    parts = []
    for h in range(num_heads):  # static unroll over heads; slices are static -> free views
        sl = pl.ds(h * dh, dh)
        q = q_ref[:, sl]
        k = k_ref[:, sl]
        v = v_ref[:, sl]
        s = jax.lax.dot_general(
            q, k, (((1,), (1,)), ((), ())), preferred_element_type=jnp.float32
        ) * scale
        s = s - jnp.max(s, axis=-1, keepdims=True)
        p = jnp.exp(s)
        denom = jnp.sum(p, axis=-1, keepdims=True)
        o = jnp.dot(p, v, preferred_element_type=jnp.float32)
        parts.append(o / denom)
    # single lane-dense (tm, E) store
    o_ref[...] = jnp.concatenate(parts, axis=-1).astype(o_ref.dtype)


def _mha(q, k, v, *, num_heads, scale, row_tile=None):
    """q: (Nq, E); k, v: (Nk, E). Returns softmax(q k^T * scale) v per head, merged (Nq, E)."""
    nq, e = q.shape
    nk = k.shape[0]
    if row_tile is None:
        row_tile = _row_tile_for(nq)
    nq_pad = -(-nq // row_tile) * row_tile
    q_p = _pad_rows(q, nq_pad)

    kernel = functools.partial(_mha_kernel, num_heads=num_heads, scale=scale)
    out = pl.pallas_call(
        kernel,
        out_shape=jax.ShapeDtypeStruct((nq_pad, e), q.dtype),
        grid_spec=pltpu.PrefetchScalarGridSpec(
            num_scalar_prefetch=0,
            grid=(nq_pad // row_tile,),
            in_specs=[
                pl.BlockSpec((row_tile, e), lambda i: (i, 0)),
                pl.BlockSpec((nk, e), lambda i: (0, 0)),
                pl.BlockSpec((nk, e), lambda i: (0, 0)),
            ],
            out_specs=pl.BlockSpec((row_tile, e), lambda i: (i, 0)),
        ),
        compiler_params=pltpu.CompilerParams(dimension_semantics=("parallel",)),
    )(q_p, k, v)
    return out[:nq]


# --------------------------------------------------------------------------- kernel 3: to_out + FFN + residual
def _out_ffn_kernel(x_ref, m_ref, wo_ref, bo_ref, w1x_ref, w1m_ref, b1_ref,
                    lng_ref, lnb_ref, w2_ref, b2_ref, y_ref, *, ln_eps):
    x = x_ref[...].astype(jnp.float32)                                        # (tm, E)
    m = m_ref[...]                                                            # (tm, E)
    mo = jnp.dot(m, wo_ref[...], preferred_element_type=jnp.float32) + bo_ref[...]
    # cat([x, mo], -1) @ W1^T  ==  x @ W1^T[:E] + mo @ W1^T[E:]  (avoids lane-dim concat)
    h = (jnp.dot(x, w1x_ref[...], preferred_element_type=jnp.float32)
         + jnp.dot(mo, w1m_ref[...], preferred_element_type=jnp.float32)
         + b1_ref[...])                                                       # (tm, 2E)
    mu = jnp.mean(h, axis=-1, keepdims=True)
    hc = h - mu
    var = jnp.mean(hc * hc, axis=-1, keepdims=True)
    hn = hc * jax.lax.rsqrt(var + ln_eps) * lng_ref[...] + lnb_ref[...]
    # tanh-approximate GELU (see TODO in header)
    c = jnp.float32(0.7978845608028654)  # sqrt(2/pi)
    act = 0.5 * hn * (1.0 + jnp.tanh(c * (hn + 0.044715 * hn * hn * hn)))
    y = jnp.dot(act, w2_ref[...], preferred_element_type=jnp.float32) + b2_ref[...]
    y_ref[...] = (x + y).astype(y_ref.dtype)                                  # residual


def _out_ffn(x, m, wo_t, bo, w1x_t, w1m_t, b1, ln_w, ln_b, w2_t, b2,
             *, ln_eps=1e-5, row_tile=None):
    n, e = x.shape
    e2 = w1x_t.shape[1]
    if row_tile is None:
        row_tile = _row_tile_for(n)
    n_pad = -(-n // row_tile) * row_tile
    x_p = _pad_rows(x, n_pad)
    m_p = _pad_rows(m, n_pad)

    kernel = functools.partial(_out_ffn_kernel, ln_eps=ln_eps)
    out = pl.pallas_call(
        kernel,
        out_shape=jax.ShapeDtypeStruct((n_pad, e), x.dtype),
        grid_spec=pltpu.PrefetchScalarGridSpec(
            num_scalar_prefetch=0,
            grid=(n_pad // row_tile,),
            in_specs=[
                pl.BlockSpec((row_tile, e), lambda i: (i, 0)),   # x tile
                pl.BlockSpec((row_tile, e), lambda i: (i, 0)),   # m tile
                pl.BlockSpec((e, e), lambda i: (0, 0)),          # to_out W^T
                pl.BlockSpec((1, e), lambda i: (0, 0)),          # to_out b
                pl.BlockSpec((e, e2), lambda i: (0, 0)),         # ffn W1^T (x half)
                pl.BlockSpec((e, e2), lambda i: (0, 0)),         # ffn W1^T (m half)
                pl.BlockSpec((1, e2), lambda i: (0, 0)),         # ffn b1
                pl.BlockSpec((1, e2), lambda i: (0, 0)),         # LayerNorm gamma
                pl.BlockSpec((1, e2), lambda i: (0, 0)),         # LayerNorm beta
                pl.BlockSpec((e2, e), lambda i: (0, 0)),         # ffn W2^T
                pl.BlockSpec((1, e), lambda i: (0, 0)),          # ffn b2
            ],
            out_specs=pl.BlockSpec((row_tile, e), lambda i: (i, 0)),
        ),
        compiler_params=pltpu.CompilerParams(dimension_semantics=("parallel",)),
    )(x_p, m_p, wo_t, bo.reshape(1, e), w1x_t, w1m_t, b1.reshape(1, e2),
      ln_w.reshape(1, e2), ln_b.reshape(1, e2), w2_t, b2.reshape(1, e))
    return out[:n]


# --------------------------------------------------------------------------- full CrossBlock forward
def cross_block_forward(x0, x1, params, num_heads):
    """x0, x1: (1, N, E) float32.  Returns (x0_out, x1_out), each (1, N, E)."""
    assert x0.ndim == 3 and x0.shape[0] == 1 and x1.shape[0] == 1
    e = x0.shape[-1]
    dh = e // num_heads
    scale = 1.0 / math.sqrt(dh)
    x0s, x1s = x0[0], x1[0]
    n0, n1 = x0s.shape[0], x1s.shape[0]

    p = params
    # fused [to_qk | to_v] projection: one matmul per input
    w_qkv_t = jnp.concatenate([p["to_qk_w"].T, p["to_v_w"].T], axis=1)   # (E, 2E)
    b_qkv = jnp.concatenate([p["to_qk_b"], p["to_v_b"]])                 # (2E,)

    qkv0 = _linear(x0s, w_qkv_t, b_qkv)   # (N0, 2E)
    qkv1 = _linear(x1s, w_qkv_t, b_qkv)   # (N1, 2E)
    qk0, v0 = qkv0[:, :e], qkv0[:, e:]
    qk1, v1 = qkv1[:, :e], qkv1[:, e:]

    # cross-attention (heads handled inside the kernel; merged (N, E) layout throughout)
    m0 = _mha(qk0, qk1, v1, num_heads=num_heads, scale=scale)   # (N0, E)
    m1 = _mha(qk1, qk0, v0, num_heads=num_heads, scale=scale)   # (N1, E)

    wo_t = p["to_out_w"].T                # (E, E)
    w1_t = p["ffn_w1"].T                  # (2E, 2E)
    w1x_t, w1m_t = w1_t[:e], w1_t[e:]
    w2_t = p["ffn_w2"].T                  # (2E, E)

    y0 = _out_ffn(x0s, m0, wo_t, p["to_out_b"], w1x_t, w1m_t, p["ffn_b1"],
                  p["ln_w"], p["ln_b"], w2_t, p["ffn_b2"])
    y1 = _out_ffn(x1s, m1, wo_t, p["to_out_b"], w1x_t, w1m_t, p["ffn_b1"],
                  p["ln_w"], p["ln_b"], w2_t, p["ffn_b2"])
    assert n0 == y0.shape[0] and n1 == y1.shape[0]
    return y0[None], y1[None]


# --------------------------------------------------------------------------- pure-JAX reference
def _reference(x0, x1, p, num_heads):
    e = x0.shape[-1]
    dh = e // num_heads

    def lin(x, w, b):
        return x @ w.T + b

    def heads(a):
        n = a.shape[0]
        return a.reshape(n, num_heads, dh).transpose(1, 0, 2)

    def merge(a):
        h, n, d = a.shape
        return a.transpose(1, 0, 2).reshape(n, h * d)

    def attn(q, k, v):
        s = jnp.einsum("hqd,hkd->hqk", q, k) / jnp.sqrt(jnp.float32(dh))
        w = jax.nn.softmax(s, axis=-1)
        return jnp.einsum("hqk,hkd->hqd", w, v)

    def gelu_tanh(x):
        c = 0.7978845608028654
        return 0.5 * x * (1.0 + jnp.tanh(c * (x + 0.044715 * x ** 3)))

    def ffn(t):
        h = lin(t, p["ffn_w1"], p["ffn_b1"])
        mu = h.mean(-1, keepdims=True)
        var = ((h - mu) ** 2).mean(-1, keepdims=True)
        h = (h - mu) / jnp.sqrt(var + 1e-5) * p["ln_w"] + p["ln_b"]
        return lin(gelu_tanh(h), p["ffn_w2"], p["ffn_b2"])

    x0s, x1s = x0[0], x1[0]
    qk0 = lin(x0s, p["to_qk_w"], p["to_qk_b"])
    qk1 = lin(x1s, p["to_qk_w"], p["to_qk_b"])
    v0 = lin(x0s, p["to_v_w"], p["to_v_b"])
    v1 = lin(x1s, p["to_v_w"], p["to_v_b"])
    m0 = merge(attn(heads(qk0), heads(qk1), heads(v1)))
    m1 = merge(attn(heads(qk1), heads(qk0), heads(v0)))
    m0 = lin(m0, p["to_out_w"], p["to_out_b"])
    m1 = lin(m1, p["to_out_w"], p["to_out_b"])
    y0 = x0s + ffn(jnp.concatenate([x0s, m0], -1))
    y1 = x1s + ffn(jnp.concatenate([x1s, m1], -1))
    return y0[None], y1[None]


# --------------------------------------------------------------------------- demo / check
if __name__ == "__main__":
    E, H, N = 256, 4, 128        # embed_dim=256, num_heads=4 -> head_dim=64 (MHAHeadDim64)
    key = jax.random.PRNGKey(0)
    ks = jax.random.split(key, 16)

    def w_init(k, shape, fan_in):
        return jax.random.normal(k, shape, jnp.float32) / jnp.sqrt(jnp.float32(fan_in))

    params = {
        "to_qk_w": w_init(ks[0], (E, E), E),
        "to_qk_b": 0.1 * jax.random.normal(ks[1], (E,), jnp.float32),
        "to_v_w": w_init(ks[2], (E, E), E),
        "to_v_b": 0.1 * jax.random.normal(ks[3], (E,), jnp.float32),
        "to_out_w": w_init(ks[4], (E, E), E),
        "to_out_b": 0.1 * jax.random.normal(ks[5], (E,), jnp.float32),
        "ffn_w1": w_init(ks[6], (2 * E, 2 * E), 2 * E),
        "ffn_b1": 0.1 * jax.random.normal(ks[7], (2 * E,), jnp.float32),
        "ln_w": 1.0 + 0.1 * jax.random.normal(ks[8], (2 * E,), jnp.float32),
        "ln_b": 0.1 * jax.random.normal(ks[9], (2 * E,), jnp.float32),
        "ffn_w2": w_init(ks[10], (E, 2 * E), 2 * E),
        "ffn_b2": 0.1 * jax.random.normal(ks[11], (E,), jnp.float32),
    }
    x0 = jax.random.normal(ks[12], (1, N, E), jnp.float32)
    x1 = jax.random.normal(ks[13], (1, N, E), jnp.float32)

    y0, y1 = cross_block_forward(x0, x1, params, H)
    y0 = jax.block_until_ready(y0)
    y1 = jax.block_until_ready(y1)

    r0, r1 = _reference(x0, x1, params, H)
    assert y0.shape == x0.shape and y1.shape == x1.shape
    assert y0.dtype == jnp.float32 and y1.dtype == jnp.float32
    err0 = float(jnp.max(jnp.abs(y0 - r0)))
    err1 = float(jnp.max(jnp.abs(y1 - r1)))
    assert jnp.allclose(y0, r0, atol=2e-3, rtol=2e-3), err0
    assert jnp.allclose(y1, r1, atol=2e-3, rtol=2e-3), err1

    print("KERNEL_OK")
</pallas_src>

<mosaic_0001>
module attributes {stable_mosaic.version = 11 : i64} {
  func.func @_proj_kernel(%arg0: i32, %arg1: memref<64x256xf32, #tpu.memory_space<vmem>>, %arg2: memref<256x512xf32, #tpu.memory_space<vmem>>, %arg3: memref<1x512xf32, #tpu.memory_space<vmem>>, %arg4: memref<64x512xf32, #tpu.memory_space<vmem>>) attributes {dimension_semantics = [#tpu.dimension_semantics<parallel>], iteration_bounds = array<i64: 2>, scalar_prefetch = 0 : i64, scratch_operands = 0 : i64, tpu.core_type = #tpu.core_type<tc>, window_params = [{transform_indices = @transform_0, window_bounds = array<i64: 64, 256>}, {pipeline_mode = #tpu.pipeline_mode<synchronous>, transform_indices = @transform_1, window_bounds = array<i64: 256, 512>}, {pipeline_mode = #tpu.pipeline_mode<synchronous>, transform_indices = @transform_2, window_bounds = array<i64: 1, 512>}, {transform_indices = @transform_3, window_bounds = array<i64: 64, 512>}]} {
    %c0 = arith.constant 0 : index
    %c0_0 = arith.constant 0 : index
    %0 = vector.load %arg1[%c0, %c0_0] : memref<64x256xf32, #tpu.memory_space<vmem>>, vector<64x256xf32>
    %c0_1 = arith.constant 0 : index
    %c0_2 = arith.constant 0 : index
    %1 = vector.load %arg2[%c0_1, %c0_2] : memref<256x512xf32, #tpu.memory_space<vmem>>, vector<256x512xf32>
    %cst = arith.constant dense<0.000000e+00> : vector<64x512xf32>
    %2 = tpu.matmul %0, %1, %cst {dimension_numbers = #tpu.dot_dimension_numbers<[1], [0], [0], [1], [0, 0, 1, 1], [], []>} : vector<64x256xf32>, vector<256x512xf32>, vector<64x512xf32> -> vector<64x512xf32>
    %c0_3 = arith.constant 0 : index
    %c0_4 = arith.constant 0 : index
    %3 = vector.load %arg3[%c0_3, %c0_4] : memref<1x512xf32, #tpu.memory_space<vmem>>, vector<1x512xf32>
    %4 = vector.broadcast %3 : vector<1x512xf32> to vector<64x512xf32>
    %5 = arith.addf %2, %4 : vector<64x512xf32>
    %c0_5 = arith.constant 0 : index
    %c0_6 = arith.constant 0 : index
    %6 = vector.load %arg4[%c0_5, %c0_6] : memref<64x512xf32, #tpu.memory_space<vmem>>, vector<64x512xf32>
    tpu.vector_store %arg4[%c0_5, %c0_6], %5 {strides = array<i32>} : memref<64x512xf32, #tpu.memory_space<vmem>>, vector<64x512xf32>,
    return
  }
  func.func @transform_0(%arg0: i32) -> (i32, i32) {
    %c0_i32 = arith.constant 0 : i32
    %c0_i32_0 = arith.constant 0 : i32
    return %arg0, %c0_i32 : i32, i32
  }
  func.func @transform_1(%arg0: i32) -> (i32, i32) {
    %c0_i32 = arith.constant 0 : i32
    %c0_i32_0 = arith.constant 0 : i32
    %c0_i32_1 = arith.constant 0 : i32
    return %c0_i32, %c0_i32_0 : i32, i32
  }
  func.func @transform_2(%arg0: i32) -> (i32, i32) {
    %c0_i32 = arith.constant 0 : i32
    %c0_i32_0 = arith.constant 0 : i32
    %c0_i32_1 = arith.constant 0 : i32
    return %c0_i32, %c0_i32_0 : i32, i32
  }
  func.func @transform_3(%arg0: i32) -> (i32, i32) {
    %c0_i32 = arith.constant 0 : i32
    %c0_i32_0 = arith.constant 0 : i32
    return %arg0, %c0_i32 : i32, i32
  }
}

</mosaic_0001>

<bundles_post_ra>
// kernel: tpu_custom_call.1
= control target key start
LH: loop header
LB: loop body
LE: loop exit
PB: predicated region body
PF: predicated region fallthrough
CT: control target
= control target key end

     0   :  { %8 = vsyncpa [#allocation3], 0  ;;  %s1309_s0 = inlined_call_operand.hbm [shape: f32[128,256], index: 0, kind: input, shape index: {}]   ;;  %s1310_s1 = inlined_call_operand.hbm [shape: f32[256,512], index: 1, kind: input, shape index: {}]   ;;  %s1311_s2 = inlined_call_operand.hbm [shape: f32[1,512], index: 2, kind: input, shape index: {}]   ;;  %s1312_s3 = inlined_call_operand.hbm [shape: f32[128,512], index: 3, kind: output, shape index: {}]  }
   0x1   :  { %10 = vsyncpa [#allocation3 + $0x1], 0 }
   0x2   :  { %11 = vsyncpa [#allocation6], 0 }
   0x3   :  { %12 = vsyncpa [#allocation4], 0 }
   0x4   :  { %14 = vsyncpa [#allocation4 + $0x1], 0  ;;  %s1027_s12 = smov 0   ;;  %s1029_s13 = smov 0  }
   0x5   :  { %s1031_s14 = smov 0   ;;  %s1033_s15 = smov 0  }
   0x6 LB: > { %s1048_s16 = sadd.s32 4294967295, %s995_s15   ;;  %s750_s17 = sadd.s32 4294967294, %s995_s15   ;;  %s995_s15 = sphi %s1033_s15, %s1334_s15   ;;  %s991_s14 = sphi %s1031_s14, %s1333_s14   ;;  %s987_s13 = sphi %s1029_s13, %s1332_s13   ;;  %s983_s12 = sphi %s1027_s12, %s1331_s12  }
   0x7   : > { %p40_p0 = scmp.ne.s32.totalorder %s987_s13, %s983_s12  ;;  %p1313_p1 = scmp.eq.s32.totalorder %s1048_s16, 0 }
   0x8   : > { %p112_p3 = scmp.eq.s32.totalorder %s750_s17, 1  ;;  %p751_p5 = scmp.ge.s32.totalorder %s995_s15, 1 }
   0x9   : > { %p1057_p4 = por %p1313_p1, %p40_p0  ;;  %p119_p7 = scmp.lt.s32.totalorder %s995_s15, 3 }
   0xa   : > { %p1062_p6 = por %p112_p3, %p40_p0  ;;  %s997_s21 = smov [#allocation5]  }
   0xb   : > { %s1317_s18 = scalar_select %p1057_p4, 1, 0 }
   0xc   : > { %s1318_s19 = scalar_select %p1062_p6, 1, 0 }
   0xd   : > { %p1067_p8 = pnand %p751_p5, %p119_p7  ;;  %s131_s22 = sshll.u32 %s997_s21, 4  ;;  %s132_s22 = int_to_ptr.vmem [resolvable:$true] %s131_s22 }
   0xe   : > { %s998_s24 = smov [#allocation7]   ;;  %s858_s26 = scalar_lea.vmem %s132_s22, 16384 }
   0xf   : > { %s1319_s20 = scalar_select %p1067_p8, 1, 0 }
  0x10   : > { %p786_p9 = pneg %p1067_p8  ;;  %s145_s25 = sshll.u32 %s998_s24, 4  ;;  %s146_s25 = int_to_ptr.vmem [resolvable:$true] %s145_s25 }
  0x11   : > { %p859_p13 = scmp.ne.s32.totalorder %s132_s22, %s858_s26  ;;  %p866_p5 = scmp.lt.s32.totalorder %s132_s22, %s132_s22 }
  0x12   : > { %p1076_p11 = pnand %p786_p9, %p1313_p1  ;;  %p867_p7 = scmp.lt.s32.totalorder %s858_s26, %s858_s26 }
  0x14   : > { %p849_p12 = pneg %p1076_p11  ;;  %p868_p10 = por %p867_p7, %p866_p5 }
  0x16   : > { %p861_p0 = pnand %p859_p13, %p849_p12 }
  0x18   : > { %p862_p3 = pneg %p861_p0 }
  0x1a   : > { %p869_p9 = pnand %p868_p10, %p862_p3 }
  0x1c   : > { %872 = shalt.err (!%p869_p9)
}
  0x1d   : > { %s999_s27 = smov 512   ;;  %s1000_s28 = smov 32  }
  0x1e   : > { %789 = dma.hbm_to_vmem [thread:$0]  (!%p1076_p11), %s1310_s1, 16384, %s132_s22, [#allocation6], %s999_s27, %s999_s27, %s1000_s28  }
  0x1f   : > { %s884_s4 = scalar_lea.vmem %s146_s25, 64  ;;  %p892_p2 = scmp.lt.s32.totalorder %s146_s25, %s146_s25 }
  0x20   : > { %p885_p1 = scmp.ne.s32.totalorder %s146_s25, %s884_s4  ;;  %p893_p6 = scmp.lt.s32.totalorder %s884_s4, %s884_s4 }
  0x22   : > { %p887_p13 = pnand %p885_p1, %p849_p12  ;;  %p894_p5 = por %p893_p6, %p892_p2 }
  0x24   : > { %p888_p0 = pneg %p887_p13 }
  0x26   : > { %p895_p10 = pnand %p894_p5, %p888_p0 }
  0x28   : > { %898 = shalt.err (!%p895_p10)
}
  0x29   : > { %792 = dma.hbm_to_vmem [thread:$0]  (!%p1076_p11), %s1311_s2, 64, %s146_s25, [#allocation6]  }
  0x2a   : > { %s1099_s7 = sadd.s32 1, %s995_s15   ;;  %s27_s8 = sadd.s32 1, %s991_s14 }
  0x2b   : > { %s24_s9 = ssub.s32 %s995_s15, %s1099_s7  ;;  %p34_p1 = scmp.ne.s32.totalorder %s991_s14, %s987_s13 }
  0x2c   : > { %p25_p2 = scmp.eq.s32.totalorder %s24_s9, 0  ;;  %p35_p6 = scmp.eq.s32.totalorder %s995_s15, 0 }
  0x2d   : > { %p1321_p12 = scmp.eq.s32.totalorder %s1048_s16, 1  ;;  %p803_p7 = scmp.lt.s32.totalorder %s995_s15, 2 }
  0x2e   : > { %s1115_s11 = scalar_select %p25_p2, %s991_s14, %s27_s8  }
  0x2f   : > { %p1109_p3 = por %p1321_p12, %p34_p1  ;;  %p36_p9 = por %p35_p6, %p34_p1 }
  0x30   : > { %s156_s17 = sand.u32 1, %s991_s14   ;;  %s771_s22 = sshll.u32 %s995_s15, 11 }
  0x31   : > { %s1322_s10 = scalar_select %p1109_p3, 1, 0 }
  0x32   : > { %s755_s21 = sshll.u32 %s156_s17, 7  ;;  %s1122_s25 = scalar_lea.hbm %s1309_s0, %s771_s22 }
  0x33   : > { %s160_s26 = scalar_lea.vmem [#allocation2], %s755_s21  ;;  %p1126_p11 = pnand %p803_p7, %p36_p9 }
  0x34   : > { %s168_s27 = sshll.u32 %s160_s26, 4  ;;  %s1130_s29 = scalar_lea.sflag [#allocation3], %s156_s17  ;;  %s1124_s27 = int_to_ptr.vmem [resolvable:$true] %s168_s27 }
  0x35   : > { %s899_s30 = scalar_lea.hbm %s1122_s25, 2048  ;;  %p901_p0 = pneg %p1126_p11 }
  0x36   : > { %p900_p13 = scmp.ne.s32.totalorder %s1122_s25, %s899_s30  ;;  %s904_s6 = scalar_lea.hbm %s1309_s0, 4096 }
  0x37   : > { %p905_p1 = scmp.lt.s32.totalorder %s1122_s25, %s1309_s0  ;;  %p906_p2 = scmp.lt.s32.totalorder %s904_s6, %s899_s30 }
  0x38   : > { %p902_p5 = pnand %p901_p0, %p900_p13 }
  0x39   : > { %p907_p6 = por %p906_p2, %p905_p1 }
  0x3a   : > { %p903_p10 = pneg %p902_p5 }
  0x3c   : > { %p908_p12 = pnand %p907_p6, %p903_p10 }
  0x3e   : > { %911 = shalt.err (!%p908_p12)
}
  0x3f   : > { %s912_s17 = scalar_lea.vmem %s1124_s27, 2048  ;;  %s1001_s21 = smov [#allocation2]  }
  0x40   : > { %p913_p7 = scmp.ne.s32.totalorder %s1124_s27, %s912_s17  ;;  %s917_s22 = sshll.u32 %s1001_s21, 4  ;;  %s918_s22 = int_to_ptr.vmem [resolvable:$false] %s917_s22 }
  0x41   : > { %s919_s23 = scalar_lea.vmem %s918_s22, 4096  ;;  %p920_p5 = scmp.lt.s32.totalorder %s1124_s27, %s918_s22 }
  0x42   : > { %p915_p9 = pnand %p913_p7, %p901_p0  ;;  %p921_p3 = scmp.lt.s32.totalorder %s919_s23, %s912_s17 }
  0x44   : > { %p916_p13 = pneg %p915_p9  ;;  %p922_p4 = por %p921_p3, %p920_p5 }
  0x46   : > { %p923_p8 = pnand %p922_p4, %p916_p13 }
  0x48   : > { %926 = shalt.err (!%p923_p8)
}
  0x49   : > { %s1002_s24 = smov 256   ;;  %s1003_s26 = smov 16  }
  0x4a   : > { %796 = dma.hbm_to_vmem [thread:$0]  (!%p1126_p11), %s1122_s25, 2048, %s1124_s27, %s1130_s29, %s1002_s24, %s1002_s24, %s1003_s26  }
  0x4b   : > { %p1324_p0 = scmp.ne.s32.totalorder %s1319_s20, 0 }
  0x4c   : > { %s1154_s30 = sand.u32 (!%p1324_p0), 1, %s987_s13   ;;  %p1325_p4 = scmp.ne.s32.totalorder (!%p1324_p0), %s1317_s18, 0 }
  0x4d   : > { %180 = sbr.rel (%p1324_p0) target bundleno = 391 (0x187), region = 32  ;;  %s760_s4 = sshll.u32 (!%p1324_p0), %s1154_s30, 7 }
  0x4e   : > { %s183_s5 = scalar_lea.sflag (!%p1324_p0), [#allocation3], %s1154_s30  ;;  %s1158_s6 = scalar_lea.vmem (!%p1324_p0), [#allocation2], %s760_s4 }
  0x52   : > { %970 = dma.done.wait (%p1325_p4), %s183_s5, 2048  }
  0x53   : > { %972 = vsyncadd (%p1325_p4), %s183_s5, 4294965248  ;;  %p1326_p8 = scmp.eq.s32.totalorder %s1048_s16, 0 }
  0x55   : > { %974 = dma.done.wait (%p1326_p8), [#allocation6], 16448   ;;  %p1327_p3 = pmov %p1326_p8 }
  0x56   : > { %v296_v0 = vld [vmem:[#allocation5 + $0x1e8] sm:$0xff]  ;;  %v298_v1 = vld [vmem:[#allocation5 + $0x1f8] sm:$0xff]  ;;  %v295_v2 = vld [vmem:[#allocation5 + $0x1e0] sm:$0xff]  ;;  %s763_s18 = sshll.u32 %s1154_s30, 8  ;;  %s773_s25 = sshll.u32 %s1048_s16, 12 }
  0x57   : > { %976 = vsyncadd (%p1327_p3), [#allocation6], 4294950848  ;;  %385 = vmatprep.subr.mxu0 %v296_v0  ;;  %498 = vmatprep.subr.mxu1 %v298_v1  ;;  %v297_v3 = vld [vmem:[#allocation5 + $0x1f0] sm:$0xff]  ;;  %v292_v4 = vld [vmem:[#allocation5 + $0x1c8] sm:$0xff]  ;;  %s1195_s20 = scalar_lea.vmem [#allocation8], %s763_s18  ;;  %s1258_s8 = scalar_lea.hbm %s1312_s3, %s773_s25 }
  0x58   : > { %v294_v5 = vld [vmem:[#allocation5 + $0x1d8] sm:$0xff]  ;;  %386 = vmatpush1.msra.mxu0 %v295_v2  ;;  %499 = vmatpush1.msra.mxu1 %v297_v3  ;;  %v291_v6 = vld [vmem:[#allocation5 + $0x1c0] sm:$0xff]  ;;  %v293_v7 = vld [vmem:[#allocation5 + $0x1d0] sm:$0xff]  ;;  %s658_s27 = sshll.u32 %s1195_s20, 4  ;;  %s644_s16 = scalar_lea.sflag [#allocation4], %s1154_s30  ;;  %s1260_s27 = int_to_ptr.vmem [resolvable:$true] %s658_s27 }
  0x59   : > { %v288_v8 = vld [vmem:[#allocation5 + $0x1a8] sm:$0xff]  ;;  %387 = vmatprep.subr.mxu0 %v292_v4  ;;  %500 = vmatprep.subr.mxu1 %v294_v5  ;;  %v290_v9 = vld [vmem:[#allocation5 + $0x1b8] sm:$0xff]  ;;  %v287_v10 = vld [vmem:[#allocation5 + $0x1a0] sm:$0xff]  ;;  %s927_s9 = scalar_lea.vmem %s1260_s27, 4096  ;;  %p1328_p10 = scmp.ne.s32.totalorder %s1322_s10, 0 }
  0x5a   : > { %v289_v11 = vld [vmem:[#allocation5 + $0x1b0] sm:$0xff]  ;;  %388 = vmatpush1.msra.mxu0 %v291_v6  ;;  %501 = vmatpush1.msra.mxu1 %v293_v7  ;;  %v284_v12 = vld [vmem:[#allocation5 + $0x188] sm:$0xff]  ;;  %v286_v13 = vld [vmem:[#allocation5 + $0x198] sm:$0xff]  ;;  %p928_p11 = scmp.ne.s32.totalorder %s1260_s27, %s927_s9  ;;  %s1004_s17 = smov [#allocation8]  }
  0x5b   : > { %389 = vmatprep.subr.mxu0 %v288_v8  ;;  %502 = vmatprep.subr.mxu1 %v290_v9  ;;  %v283_v14 = vld [vmem:[#allocation5 + $0x180] sm:$0xff]  ;;  %v285_v15 = vld [vmem:[#allocation5 + $0x190] sm:$0xff]  ;;  %v280_v16 = vld [vmem:[#allocation5 + $0x168] sm:$0xff]  ;;  %s931_s21 = sshll.u32 %s1004_s17, 4  ;;  %s932_s21 = int_to_ptr.vmem [resolvable:$false] %s931_s21 }
  0x5c   : > { %390 = vmatpush1.msra.mxu0 %v287_v10  ;;  %503 = vmatpush1.msra.mxu1 %v289_v11  ;;  %v282_v17 = vld [vmem:[#allocation5 + $0x178] sm:$0xff]  ;;  %v279_v18 = vld [vmem:[#allocation5 + $0x160] sm:$0xff]  ;;  %v281_v19 = vld [vmem:[#allocation5 + $0x170] sm:$0xff]  ;;  %p929_p1 = pnand %p928_p11, %p1328_p10  ;;  %s933_s22 = scalar_lea.vmem %s932_s21, 8192 }
  0x5d   : > { %391 = vmatprep.subr.mxu0 %v284_v12  ;;  %504 = vmatprep.subr.mxu1 %v286_v13  ;;  %v276_v20 = vld [vmem:[#allocation5 + $0x148] sm:$0xff]  ;;  %v278_v21 = vld [vmem:[#allocation5 + $0x158] sm:$0xff]  ;;  %v275_v22 = vld [vmem:[#allocation5 + $0x140] sm:$0xff]  ;;  %p934_p6 = scmp.lt.s32.totalorder %s1260_s27, %s932_s21  ;;  %p935_p12 = scmp.lt.s32.totalorder %s933_s22, %s927_s9 }
  0x5e   : > { %392 = vmatpush1.msra.mxu0 %v283_v14  ;;  %505 = vmatpush1.msra.mxu1 %v285_v15  ;;  %v277_v23 = vld [vmem:[#allocation5 + $0x150] sm:$0xff]  ;;  %v272_v24 = vld [vmem:[#allocation5 + $0x128] sm:$0xff]  ;;  %v274_v25 = vld [vmem:[#allocation5 + $0x138] sm:$0xff]  ;;  %p930_p2 = pneg %p929_p1 }
  0x5f   : > { %393 = vmatprep.subr.mxu0 %v280_v16  ;;  %506 = vmatprep.subr.mxu1 %v282_v17  ;;  %v271_v26 = vld [vmem:[#allocation5 + $0x120] sm:$0xff]  ;;  %v273_v27 = vld [vmem:[#allocation5 + $0x130] sm:$0xff]  ;;  %v268_v28 = vld [vmem:[#allocation5 + $0x108] sm:$0xff]  ;;  %p936_p7 = por %p935_p12, %p934_p6 }
  0x60   : > { %394 = vmatpush1.msra.mxu0 %v279_v18  ;;  %507 = vmatpush1.msra.mxu1 %v281_v19  ;;  %v270_v29 = vld [vmem:[#allocation5 + $0x118] sm:$0xff]  ;;  %v267_v30 = vld [vmem:[#allocation5 + $0x100] sm:$0xff]  ;;  %v269_v31 = vld [vmem:[#allocation5 + $0x110] sm:$0xff] }
  0x61   : > { %395 = vmatprep.subr.mxu0 %v276_v20  ;;  %508 = vmatprep.subr.mxu1 %v278_v21  ;;  %v264_v32 = vld [vmem:[#allocation5 + $0xe8] sm:$0xff]  ;;  %v266_v33 = vld [vmem:[#allocation5 + $0xf8] sm:$0xff]  ;;  %v263_v34 = vld [vmem:[#allocation5 + $0xe0] sm:$0xff]  ;;  %p937_p9 = pnand %p936_p7, %p930_p2 }
  0x62   : > { %396 = vmatpush1.msra.mxu0 %v275_v22  ;;  %509 = vmatpush1.msra.mxu1 %v277_v23  ;;  %v265_v35 = vld [vmem:[#allocation5 + $0xf0] sm:$0xff]  ;;  %v260_v36 = vld [vmem:[#allocation5 + $0xc8] sm:$0xff]  ;;  %v262_v37 = vld [vmem:[#allocation5 + $0xd8] sm:$0xff] }
  0x63   : > { %397 = vmatprep.subr.mxu0 %v272_v24  ;;  %510 = vmatprep.subr.mxu1 %v274_v25  ;;  %v259_v38 = vld [vmem:[#allocation5 + $0xc0] sm:$0xff]  ;;  %v261_v39 = vld [vmem:[#allocation5 + $0xd0] sm:$0xff]  ;;  %v256_v40 = vld [vmem:[#allocation5 + $0xa8] sm:$0xff] }
  0x64   : > { %398 = vmatpush1.msra.mxu0 %v271_v26  ;;  %511 = vmatpush1.msra.mxu1 %v273_v27  ;;  %v258_v41 = vld [vmem:[#allocation5 + $0xb8] sm:$0xff]  ;;  %v255_v42 = vld [vmem:[#allocation5 + $0xa0] sm:$0xff]  ;;  %v257_v43 = vld [vmem:[#allocation5 + $0xb0] sm:$0xff] }
  0x65   : > { %399 = vmatprep.subr.mxu0 %v268_v28  ;;  %512 = vmatprep.subr.mxu1 %v270_v29  ;;  %v252_v44 = vld [vmem:[#allocation5 + $0x88] sm:$0xff]  ;;  %v254_v45 = vld [vmem:[#allocation5 + $0x98] sm:$0xff]  ;;  %v251_v46 = vld [vmem:[#allocation5 + $0x80] sm:$0xff] }
  0x66   : > { %400 = vmatpush1.msra.mxu0 %v267_v30  ;;  %513 = vmatpush1.msra.mxu1 %v269_v31  ;;  %v253_v47 = vld [vmem:[#allocation5 + $0x90] sm:$0xff]  ;;  %v248_v48 = vld [vmem:[#allocation5 + $0x68] sm:$0xff]  ;;  %v250_v49 = vld [vmem:[#allocation5 + $0x78] sm:$0xff] }
  0x67   : > { %401 = vmatprep.subr.mxu0 %v264_v32  ;;  %514 = vmatprep.subr.mxu1 %v266_v33  ;;  %v247_v50 = vld [vmem:[#allocation5 + $0x60] sm:$0xff]  ;;  %v249_v51 = vld [vmem:[#allocation5 + $0x70] sm:$0xff]  ;;  %v244_v52 = vld [vmem:[#allocation5 + $0x48] sm:$0xff] }
  0x68   : > { %402 = vmatpush1.msra.mxu0 %v263_v34  ;;  %515 = vmatpush1.msra.mxu1 %v265_v35  ;;  %v246_v53 = vld [vmem:[#allocation5 + $0x58] sm:$0xff]  ;;  %v243_v54 = vld [vmem:[#allocation5 + $0x40] sm:$0xff]  ;;  %v245_v55 = vld [vmem:[#allocation5 + $0x50] sm:$0xff] }
  0x69   : > { %403 = vmatprep.subr.mxu0 %v260_v36  ;;  %516 = vmatprep.subr.mxu1 %v262_v37  ;;  %v240_v56 = vld [vmem:[#allocation5 + $0x28] sm:$0xff]  ;;  %v242_v57 = vld [vmem:[#allocation5 + $0x38] sm:$0xff]  ;;  %v239_v58 = vld [vmem:[#allocation5 + $0x20] sm:$0xff] }
  0x6a   : > { %404 = vmatpush1.msra.mxu0 %v259_v38  ;;  %517 = vmatpush1.msra.mxu1 %v261_v39  ;;  %v241_v59 = vld [vmem:[#allocation5 + $0x30] sm:$0xff]  ;;  %v236_v60 = vld [vmem:[#allocation5 + $0x8] sm:$0xff]  ;;  %v238_v61 = vld [vmem:[#allocation5 + $0x18] sm:$0xff] }
  0x6b   : > { %405 = vmatprep.subr.mxu0 %v256_v40  ;;  %518 = vmatprep.subr.mxu1 %v258_v41  ;;  %v235_v62 = vld [vmem:[#allocation5] sm:$0xff]  ;;  %v237_v63 = vld [vmem:[#allocation5 + $0x10] sm:$0xff]  ;;  %v360_v0 = vld [vmem:[#allocation5 + $0x3e8] sm:$0xff] }
  0x6c   : > { %406 = vmatpush1.msra.mxu0 %v255_v42  ;;  %519 = vmatpush1.msra.mxu1 %v257_v43  ;;  %v362_v1 = vld [vmem:[#allocation5 + $0x3f8] sm:$0xff]  ;;  %v359_v2 = vld [vmem:[#allocation5 + $0x3e0] sm:$0xff]  ;;  %v361_v3 = vld [vmem:[#allocation5 + $0x3f0] sm:$0xff] }
  0x6d   : > { %407 = vmatprep.subr.mxu0 %v252_v44  ;;  %520 = vmatprep.subr.mxu1 %v254_v45  ;;  %v356_v4 = vld [vmem:[#allocation5 + $0x3c8] sm:$0xff]  ;;  %v358_v5 = vld [vmem:[#allocation5 + $0x3d8] sm:$0xff]  ;;  %v355_v6 = vld [vmem:[#allocation5 + $0x3c0] sm:$0xff] }
  0x6e   : > { %408 = vmatpush1.msra.mxu0 %v251_v46  ;;  %521 = vmatpush1.msra.mxu1 %v253_v47  ;;  %v357_v7 = vld [vmem:[#allocation5 + $0x3d0] sm:$0xff]  ;;  %v352_v8 = vld [vmem:[#allocation5 + $0x3a8] sm:$0xff]  ;;  %v354_v9 = vld [vmem:[#allocation5 + $0x3b8] sm:$0xff] }
  0x6f   : > { %409 = vmatprep.subr.mxu0 %v248_v48  ;;  %522 = vmatprep.subr.mxu1 %v250_v49  ;;  %v351_v10 = vld [vmem:[#allocation5 + $0x3a0] sm:$0xff]  ;;  %v353_v11 = vld [vmem:[#allocation5 + $0x3b0] sm:$0xff]  ;;  %v348_v12 = vld [vmem:[#allocation5 + $0x388] sm:$0xff] }
  0x70   : > { %410 = vmatpush1.msra.mxu0 %v247_v50  ;;  %523 = vmatpush1.msra.mxu1 %v249_v51  ;;  %v350_v13 = vld [vmem:[#allocation5 + $0x398] sm:$0xff]  ;;  %v347_v14 = vld [vmem:[#allocation5 + $0x380] sm:$0xff]  ;;  %v349_v15 = vld [vmem:[#allocation5 + $0x390] sm:$0xff] }
  0x71   : > { %411 = vmatprep.subr.mxu0 %v244_v52  ;;  %524 = vmatprep.subr.mxu1 %v246_v53  ;;  %v344_v16 = vld [vmem:[#allocation5 + $0x368] sm:$0xff]  ;;  %v346_v17 = vld [vmem:[#allocation5 + $0x378] sm:$0xff]  ;;  %v343_v18 = vld [vmem:[#allocation5 + $0x360] sm:$0xff] }
  0x72   : > { %412 = vmatpush1.msra.mxu0 %v243_v54  ;;  %525 = vmatpush1.msra.mxu1 %v245_v55  ;;  %v345_v19 = vld [vmem:[#allocation5 + $0x370] sm:$0xff]  ;;  %v340_v20 = vld [vmem:[#allocation5 + $0x348] sm:$0xff]  ;;  %v342_v21 = vld [vmem:[#allocation5 + $0x358] sm:$0xff] }
  0x73   : > { %413 = vmatprep.subr.mxu0 %v240_v56  ;;  %526 = vmatprep.subr.mxu1 %v242_v57  ;;  %v339_v22 = vld [vmem:[#allocation5 + $0x340] sm:$0xff]  ;;  %v341_v23 = vld [vmem:[#allocation5 + $0x350] sm:$0xff]  ;;  %v336_v24 = vld [vmem:[#allocation5 + $0x328] sm:$0xff] }
  0x74   : > { %414 = vmatpush1.msra.mxu0 %v239_v58  ;;  %527 = vmatpush1.msra.mxu1 %v241_v59  ;;  %v338_v25 = vld [vmem:[#allocation5 + $0x338] sm:$0xff]  ;;  %v335_v26 = vld [vmem:[#allocation5 + $0x320] sm:$0xff]  ;;  %v337_v27 = vld [vmem:[#allocation5 + $0x330] sm:$0xff] }
  0x75   : > { %415 = vmatprep.subr.mxu0 %v236_v60  ;;  %528 = vmatprep.subr.mxu1 %v238_v61  ;;  %v332_v28 = vld [vmem:[#allocation5 + $0x308] sm:$0xff]  ;;  %v334_v29 = vld [vmem:[#allocation5 + $0x318] sm:$0xff]  ;;  %v331_v30 = vld [vmem:[#allocation5 + $0x300] sm:$0xff] }
  0x76   : > { %416 = vmatpush1.msra.mxu0 %v235_v62  ;;  %529 = vmatpush1.msra.mxu1 %v237_v63  ;;  %v333_v31 = vld [vmem:[#allocation5 + $0x310] sm:$0xff]  ;;  %v328_v32 = vld [vmem:[#allocation5 + $0x2e8] sm:$0xff]  ;;  %v330_v33 = vld [vmem:[#allocation5 + $0x2f8] sm:$0xff] }
  0x77   : > { %417 = vmatprep.subr.mxu0 %v360_v0  ;;  %530 = vmatprep.subr.mxu1 %v362_v1  ;;  %v327_v34 = vld [vmem:[#allocation5 + $0x2e0] sm:$0xff]  ;;  %v329_v35 = vld [vmem:[#allocation5 + $0x2f0] sm:$0xff]  ;;  %v324_v36 = vld [vmem:[#allocation5 + $0x2c8] sm:$0xff] }
  0x78   : > { %418 = vmatpush2.msra.mxu0 %v359_v2  ;;  %531 = vmatpush2.msra.mxu1 %v361_v3  ;;  %v326_v37 = vld [vmem:[#allocation5 + $0x2d8] sm:$0xff]  ;;  %v323_v38 = vld [vmem:[#allocation5 + $0x2c0] sm:$0xff]  ;;  %v325_v39 = vld [vmem:[#allocation5 + $0x2d0] sm:$0xff] }
  0x79   : > { %419 = vmatprep.subr.mxu0 %v356_v4  ;;  %532 = vmatprep.subr.mxu1 %v358_v5  ;;  %v320_v40 = vld [vmem:[#allocation5 + $0x2a8] sm:$0xff]  ;;  %v322_v41 = vld [vmem:[#allocation5 + $0x2b8] sm:$0xff]  ;;  %v319_v42 = vld [vmem:[#allocation5 + $0x2a0] sm:$0xff] }
  0x7a   : > { %420 = vmatpush2.msra.mxu0 %v355_v6  ;;  %533 = vmatpush2.msra.mxu1 %v357_v7  ;;  %v321_v43 = vld [vmem:[#allocation5 + $0x2b0] sm:$0xff]  ;;  %v316_v44 = vld [vmem:[#allocation5 + $0x288] sm:$0xff]  ;;  %v318_v45 = vld [vmem:[#allocation5 + $0x298] sm:$0xff] }
  0x7b   : > { %421 = vmatprep.subr.mxu0 %v352_v8  ;;  %534 = vmatprep.subr.mxu1 %v354_v9  ;;  %v315_v46 = vld [vmem:[#allocation5 + $0x280] sm:$0xff]  ;;  %v317_v47 = vld [vmem:[#allocation5 + $0x290] sm:$0xff]  ;;  %v312_v48 = vld [vmem:[#allocation5 + $0x268] sm:$0xff] }
  0x7c   : > { %422 = vmatpush2.msra.mxu0 %v351_v10  ;;  %535 = vmatpush2.msra.mxu1 %v353_v11  ;;  %v314_v49 = vld [vmem:[#allocation5 + $0x278] sm:$0xff]  ;;  %v311_v50 = vld [vmem:[#allocation5 + $0x260] sm:$0xff]  ;;  %v313_v51 = vld [vmem:[#allocation5 + $0x270] sm:$0xff] }
  0x7d   : > { %423 = vmatprep.subr.mxu0 %v348_v12  ;;  %536 = vmatprep.subr.mxu1 %v350_v13  ;;  %v308_v52 = vld [vmem:[#allocation5 + $0x248] sm:$0xff]  ;;  %v310_v53 = vld [vmem:[#allocation5 + $0x258] sm:$0xff]  ;;  %v307_v54 = vld [vmem:[#allocation5 + $0x240] sm:$0xff] }
  0x7e   : > { %424 = vmatpush2.msra.mxu0 %v347_v14  ;;  %537 = vmatpush2.msra.mxu1 %v349_v15  ;;  %v309_v55 = vld [vmem:[#allocation5 + $0x250] sm:$0xff]  ;;  %v304_v56 = vld [vmem:[#allocation5 + $0x228] sm:$0xff]  ;;  %v306_v57 = vld [vmem:[#allocation5 + $0x238] sm:$0xff] }
  0x7f   : > { %425 = vmatprep.subr.mxu0 %v344_v16  ;;  %538 = vmatprep.subr.mxu1 %v346_v17  ;;  %v303_v58 = vld [vmem:[#allocation5 + $0x220] sm:$0xff]  ;;  %v305_v59 = vld [vmem:[#allocation5 + $0x230] sm:$0xff]  ;;  %v300_v60 = vld [vmem:[#allocation5 + $0x208] sm:$0xff]  ;;  %v365_v16 = vlaneseq }
  0x80   : > { %426 = vmatpush2.msra.mxu0 %v343_v18  ;;  %539 = vmatpush2.msra.mxu1 %v345_v19  ;;  %v302_v61 = vld [vmem:[#allocation5 + $0x218] sm:$0xff]  ;;  %v299_v62 = vld [vmem:[#allocation5 + $0x200] sm:$0xff]  ;;  %v220_v63 = vld [vmem:[%s1158_s6 + $0x8] sm:$0xff] }
  0x81   : > { %427 = vmatprep.subr.mxu0 %v340_v20  ;;  %540 = vmatprep.subr.mxu1 %v342_v21  ;;  %v301_v0 = vld [vmem:[#allocation5 + $0x210] sm:$0xff]  ;;  %v219_v1 = vld [vmem:[%s1158_s6] sm:$0xff]  ;;  %v222_v2 = vld [vmem:[%s1158_s6 + $0x18] sm:$0xff]  ;;  %v366_v17 = vshrl.u32 %v365_v16, 7 }
  0x82   : > { %428 = vmatpush2.msra.mxu0 %v339_v22  ;;  %541 = vmatpush2.msra.mxu1 %v341_v23  ;;  %v221_v3 = vld [vmem:[%s1158_s6 + $0x10] sm:$0xff]  ;;  %v224_v4 = vld [vmem:[%s1158_s6 + $0x28] sm:$0xff]  ;;  %v223_v5 = vld [vmem:[%s1158_s6 + $0x20] sm:$0xff] }
  0x83   : > { %429 = vmatprep.subr.mxu0 %v336_v24  ;;  %542 = vmatprep.subr.mxu1 %v338_v25  ;;  %v226_v6 = vld [vmem:[%s1158_s6 + $0x38] sm:$0xff]  ;;  %v225_v7 = vld [vmem:[%s1158_s6 + $0x30] sm:$0xff]  ;;  %v228_v8 = vld [vmem:[%s1158_s6 + $0x48] sm:$0xff]  ;;  %v367_v18 = vsub.s32 0, %v366_v17  ;;  %v375_v19 = vsub.s32 2, %v366_v17  ;;  %v371_v21 = vsub.s32 1, %v366_v17 }
  0x84   : > { %430 = vmatpush2.msra.mxu0 %v335_v26  ;;  %543 = vmatpush2.msra.mxu1 %v337_v27  ;;  %v227_v9 = vld [vmem:[%s1158_s6 + $0x40] sm:$0xff]  ;;  %v230_v10 = vld [vmem:[%s1158_s6 + $0x58] sm:$0xff]  ;;  %v229_v11 = vld [vmem:[%s1158_s6 + $0x50] sm:$0xff]  ;;  %v379_v22 = vsub.s32 3, %v366_v17 }
  0x85   : > { %431 = vmatprep.subr.mxu0 %v332_v28  ;;  %544 = vmatprep.subr.mxu1 %v334_v29  ;;  %v232_v12 = vld [vmem:[%s1158_s6 + $0x68] sm:$0xff]  ;;  %v231_v13 = vld [vmem:[%s1158_s6 + $0x60] sm:$0xff]  ;;  %v234_v14 = vld [vmem:[%s1158_s6 + $0x78] sm:$0xff] }
  0x86   : > { %432 = vmatpush2.msra.mxu0 %v331_v30  ;;  %545 = vmatpush2.msra.mxu1 %v333_v31  ;;  %v233_v15 = vld [vmem:[%s1158_s6 + $0x70] sm:$0xff]  ;;  %v363_v20 = vld [vmem:[#allocation7] sm:$0xf] }
  0x87   : > { %433 = vmatprep.subr.mxu0 %v328_v32  ;;  %546 = vmatprep.subr.mxu1 %v330_v33  ;;  %v1185_v23 = vrot.slane %v363_v20, %v367_v18  ;;  %v1187_v24 = vrot.slane %v363_v20, %v375_v19  ;;  %v1189_v25 = vrot.slane %v363_v20, %v371_v21 }
  0x88   : > { %434 = vmatpush2.msra.mxu0 %v327_v34  ;;  %547 = vmatpush2.msra.mxu1 %v329_v35  ;;  %v1191_v26 = vrot.slane %v363_v20, %v379_v22 }
  0x89   : > { %435 = vmatprep.subr.mxu0 %v324_v36  ;;  %548 = vmatprep.subr.mxu1 %v326_v37 }
  0x8a   : > { %436 = vmatpush2.msra.mxu0 %v323_v38  ;;  %549 = vmatpush2.msra.mxu1 %v325_v39 }
  0x8b   : > { %437 = vmatprep.subr.mxu0 %v320_v40  ;;  %550 = vmatprep.subr.mxu1 %v322_v41 }
  0x8c   : > { %438 = vmatpush2.msra.mxu0 %v319_v42  ;;  %551 = vmatpush2.msra.mxu1 %v321_v43 }
  0x8d   : > { %439 = vmatprep.subr.mxu0 %v316_v44  ;;  %552 = vmatprep.subr.mxu1 %v318_v45 }
  0x8e   : > { %440 = vmatpush2.msra.mxu0 %v315_v46  ;;  %553 = vmatpush2.msra.mxu1 %v317_v47 }
  0x8f   : > { %441 = vmatprep.subr.mxu0 %v312_v48  ;;  %554 = vmatprep.subr.mxu1 %v314_v49 }
  0x90   : > { %442 = vmatpush2.msra.mxu0 %v311_v50  ;;  %555 = vmatpush2.msra.mxu1 %v313_v51 }
  0x91   : > { %443 = vmatprep.subr.mxu0 %v308_v52  ;;  %556 = vmatprep.subr.mxu1 %v310_v53 }
  0x92   : > { %444 = vmatpush2.msra.mxu0 %v307_v54  ;;  %557 = vmatpush2.msra.mxu1 %v309_v55 }
  0x93   : > { %445 = vmatprep.subr.mxu0 %v304_v56  ;;  %558 = vmatprep.subr.mxu1 %v306_v57 }
  0x94   : > { %446 = vmatpush2.msra.mxu0 %v303_v58  ;;  %559 = vmatpush2.msra.mxu1 %v305_v59 }
  0x95   : > { %447 = vmatprep.subr.mxu0 %v300_v60  ;;  %560 = vmatprep.subr.mxu1 %v302_v61 }
  0x96   : > { %448 = vmatpush2.msra.mxu0 %v299_v62  ;;  %449 = vmatprep.mubr.f32.mxu0 %v220_v63 }
  0x97   : > { %561 = vmatpush2.msra.mxu1 %v301_v0  ;;  %562 = vmatprep.mubr.f32.mxu1 %v220_v63 }
  0x98   : > { %450 = vmatmul.mubr.f32.vlgmr.msra.gmra.mxu0 %v219_v1  ;;  %563 = vmatmul.mubr.f32.vlgmr.msra.gmra.mxu1 %v219_v1 }
  0x99   : > { %455 = vmatprep.mubr.f32.mxu0 %v222_v2  ;;  %568 = vmatprep.mubr.f32.mxu1 %v222_v2 }
  0x9c   : > { %456 = vmatmul.mubr.f32.gmra.mxu0 %v221_v3  ;;  %569 = vmatmul.mubr.f32.gmra.mxu1 %v221_v3 }
  0x9d   : > { %461 = vmatprep.mubr.f32.mxu0 %v224_v4  ;;  %574 = vmatprep.mubr.f32.mxu1 %v224_v4 }
  0xa0   : > { %462 = vmatmul.mubr.f32.gmra.mxu0 %v223_v5  ;;  %575 = vmatmul.mubr.f32.gmra.mxu1 %v223_v5 }
  0xa1   : > { %467 = vmatprep.mubr.f32.mxu0 %v226_v6  ;;  %580 = vmatprep.mubr.f32.mxu1 %v226_v6 }
  0xa4   : > { %468 = vmatmul.mubr.f32.gmra.mxu0 %v225_v7  ;;  %581 = vmatmul.mubr.f32.gmra.mxu1 %v225_v7 }
  0xa5   : > { %473 = vmatprep.mubr.f32.mxu0 %v228_v8  ;;  %586 = vmatprep.mubr.f32.mxu1 %v228_v8 }
  0xa8   : > { %474 = vmatmul.mubr.f32.gmra.mxu0 %v227_v9  ;;  %587 = vmatmul.mubr.f32.gmra.mxu1 %v227_v9 }
  0xa9   : > { %479 = vmatprep.mubr.f32.mxu0 %v230_v10  ;;  %592 = vmatprep.mubr.f32.mxu1 %v230_v10 }
  0xac   : > { %480 = vmatmul.mubr.f32.gmra.mxu0 %v229_v11  ;;  %593 = vmatmul.mubr.f32.gmra.mxu1 %v229_v11 }
  0xad   : > { %485 = vmatprep.mubr.f32.mxu0 %v232_v12  ;;  %598 = vmatprep.mubr.f32.mxu1 %v232_v12 }
  0xb0   : > { %486 = vmatmul.mubr.f32.gmra.mxu0 %v231_v13  ;;  %599 = vmatmul.mubr.f32.gmra.mxu1 %v231_v13 }
  0xb1   : > { %491 = vmatprep.mubr.f32.mxu0 %v234_v14  ;;  %604 = vmatprep.mubr.f32.mxu1 %v234_v14 }
  0xb4   : > { %492 = vmatmul.mubr.f32.gmra.mxu0 %v233_v15  ;;  %605 = vmatmul.mubr.f32.gmra.mxu1 %v233_v15 }
 0x158   : > { %v451_v27 = vpop.f32.mrf.mxu0  ;;  %v564_v28 = vpop.f32.mrf.mxu1 }
 0x159   : > { %v452_v29 = vadd.f32 %v451_v27, %v1185_v23  ;;  %v565_v30 = vadd.f32 %v564_v28, %v1187_v24 }
 0x15a   : > { %v453_v31 = vpop.f32.mrf.mxu0  ;;  %v566_v32 = vpop.f32.mrf.mxu1 }
 0x15b   : > { %611 = vst [vmem:[%s1195_s20] sm:$0xff] %v452_v29  ;;  %613 = vst [vmem:[%s1195_s20 + $0x10] sm:$0xff] %v565_v30  ;;  %v454_v33 = vadd.f32 %v453_v31, %v1189_v25  ;;  %v567_v34 = vadd.f32 %v566_v32, %v1191_v26 }
 0x15c   : > { %v457_v35 = vpop.f32.mrf.mxu0  ;;  %v570_v36 = vpop.f32.mrf.mxu1 }
 0x15d   : > { %612 = vst [vmem:[%s1195_s20 + $0x8] sm:$0xff] %v454_v33  ;;  %614 = vst [vmem:[%s1195_s20 + $0x18] sm:$0xff] %v567_v34  ;;  %v458_v37 = vadd.f32 %v457_v35, %v1185_v23  ;;  %v571_v38 = vadd.f32 %v570_v36, %v1187_v24 }
 0x15e   : > { %v459_v39 = vpop.f32.mrf.mxu0  ;;  %v572_v40 = vpop.f32.mrf.mxu1 }
 0x15f   : > { %615 = vst [vmem:[%s1195_s20 + $0x20] sm:$0xff] %v458_v37  ;;  %617 = vst [vmem:[%s1195_s20 + $0x30] sm:$0xff] %v571_v38  ;;  %v460_v41 = vadd.f32 %v459_v39, %v1189_v25  ;;  %v573_v42 = vadd.f32 %v572_v40, %v1191_v26 }
 0x160   : > { %v463_v43 = vpop.f32.mrf.mxu0  ;;  %v576_v44 = vpop.f32.mrf.mxu1 }
 0x161   : > { %616 = vst [vmem:[%s1195_s20 + $0x28] sm:$0xff] %v460_v41  ;;  %618 = vst [vmem:[%s1195_s20 + $0x38] sm:$0xff] %v573_v42  ;;  %v464_v45 = vadd.f32 %v463_v43, %v1185_v23  ;;  %v577_v46 = vadd.f32 %v576_v44, %v1187_v24 }
 0x162   : > { %v465_v47 = vpop.f32.mrf.mxu0  ;;  %v578_v48 = vpop.f32.mrf.mxu1 }
 0x163   : > { %619 = vst [vmem:[%s1195_s20 + $0x40] sm:$0xff] %v464_v45  ;;  %621 = vst [vmem:[%s1195_s20 + $0x50] sm:$0xff] %v577_v46  ;;  %v466_v49 = vadd.f32 %v465_v47, %v1189_v25  ;;  %v579_v50 = vadd.f32 %v578_v48, %v1191_v26 }
 0x164   : > { %v469_v51 = vpop.f32.mrf.mxu0  ;;  %v582_v52 = vpop.f32.mrf.mxu1 }
 0x165   : > { %620 = vst [vmem:[%s1195_s20 + $0x48] sm:$0xff] %v466_v49  ;;  %622 = vst [vmem:[%s1195_s20 + $0x58] sm:$0xff] %v579_v50  ;;  %v470_v53 = vadd.f32 %v469_v51, %v1185_v23  ;;  %v583_v54 = vadd.f32 %v582_v52, %v1187_v24 }
 0x166   : > { %v471_v55 = vpop.f32.mrf.mxu0  ;;  %v584_v56 = vpop.f32.mrf.mxu1 }
 0x167   : > { %623 = vst [vmem:[%s1195_s20 + $0x60] sm:$0xff] %v470_v53  ;;  %625 = vst [vmem:[%s1195_s20 + $0x70] sm:$0xff] %v583_v54  ;;  %v472_v57 = vadd.f32 %v471_v55, %v1189_v25  ;;  %v585_v58 = vadd.f32 %v584_v56, %v1191_v26 }
 0x168   : > { %v475_v59 = vpop.f32.mrf.mxu0  ;;  %v588_v60 = vpop.f32.mrf.mxu1 }
 0x169   : > { %624 = vst [vmem:[%s1195_s20 + $0x68] sm:$0xff] %v472_v57  ;;  %626 = vst [vmem:[%s1195_s20 + $0x78] sm:$0xff] %v585_v58  ;;  %v476_v61 = vadd.f32 %v475_v59, %v1185_v23  ;;  %v589_v62 = vadd.f32 %v588_v60, %v1187_v24 }
 0x16a   : > { %v477_v63 = vpop.f32.mrf.mxu0  ;;  %v590_v0 = vpop.f32.mrf.mxu1 }
 0x16b   : > { %627 = vst [vmem:[%s1195_s20 + $0x80] sm:$0xff] %v476_v61  ;;  %629 = vst [vmem:[%s1195_s20 + $0x90] sm:$0xff] %v589_v62  ;;  %v478_v1 = vadd.f32 %v477_v63, %v1189_v25  ;;  %v591_v2 = vadd.f32 %v590_v0, %v1191_v26 }
 0x16c   : > { %v481_v3 = vpop.f32.mrf.mxu0  ;;  %v594_v4 = vpop.f32.mrf.mxu1 }
 0x16d   : > { %628 = vst [vmem:[%s1195_s20 + $0x88] sm:$0xff] %v478_v1  ;;  %630 = vst [vmem:[%s1195_s20 + $0x98] sm:$0xff] %v591_v2  ;;  %v482_v5 = vadd.f32 %v481_v3, %v1185_v23  ;;  %v595_v6 = vadd.f32 %v594_v4, %v1187_v24 }
 0x16e   : > { %v483_v7 = vpop.f32.mrf.mxu0  ;;  %v596_v8 = vpop.f32.mrf.mxu1 }
 0x16f   : > { %631 = vst [vmem:[%s1195_s20 + $0xa0] sm:$0xff] %v482_v5  ;;  %633 = vst [vmem:[%s1195_s20 + $0xb0] sm:$0xff] %v595_v6  ;;  %v484_v9 = vadd.f32 %v483_v7, %v1189_v25  ;;  %v597_v10 = vadd.f32 %v596_v8, %v1191_v26 }
 0x170   : > { %v487_v11 = vpop.f32.mrf.mxu0  ;;  %v600_v12 = vpop.f32.mrf.mxu1 }
 0x171   : > { %632 = vst [vmem:[%s1195_s20 + $0xa8] sm:$0xff] %v484_v9  ;;  %634 = vst [vmem:[%s1195_s20 + $0xb8] sm:$0xff] %v597_v10  ;;  %v488_v13 = vadd.f32 %v487_v11, %v1185_v23  ;;  %v601_v14 = vadd.f32 %v600_v12, %v1187_v24 }
 0x172   : > { %v489_v15 = vpop.f32.mrf.mxu0  ;;  %v602_v16 = vpop.f32.mrf.mxu1 }
 0x173   : > { %635 = vst [vmem:[%s1195_s20 + $0xc0] sm:$0xff] %v488_v13  ;;  %637 = vst [vmem:[%s1195_s20 + $0xd0] sm:$0xff] %v601_v14  ;;  %v490_v17 = vadd.f32 %v489_v15, %v1189_v25  ;;  %v603_v18 = vadd.f32 %v602_v16, %v1191_v26 }
 0x174   : > { %v493_v19 = vpop.f32.mrf.mxu0  ;;  %v606_v20 = vpop.f32.mrf.mxu1 }
 0x175   : > { %636 = vst [vmem:[%s1195_s20 + $0xc8] sm:$0xff] %v490_v17  ;;  %638 = vst [vmem:[%s1195_s20 + $0xd8] sm:$0xff] %v603_v18  ;;  %v494_v21 = vadd.f32 %v493_v19, %v1185_v23  ;;  %v607_v22 = vadd.f32 %v606_v20, %v1187_v24 }
 0x176   : > { %v495_v27 = vpop.f32.mrf.mxu0  ;;  %v608_v28 = vpop.f32.mrf.mxu1 }
 0x177   : > { %639 = vst [vmem:[%s1195_s20 + $0xe0] sm:$0xff] %v494_v21  ;;  %641 = vst [vmem:[%s1195_s20 + $0xf0] sm:$0xff] %v607_v22  ;;  %v496_v29 = vadd.f32 %v495_v27, %v1189_v25  ;;  %v609_v23 = vadd.f32 %v608_v28, %v1191_v26 }
 0x179   : > { %640 = vst [vmem:[%s1195_s20 + $0xe8] sm:$0xff] %v496_v29  ;;  %642 = vst [vmem:[%s1195_s20 + $0xf8] sm:$0xff] %v609_v23 }
 0x17a   : > { %940 = shalt.err (!%p937_p9)
}
 0x17b   : > { %s941_s23 = scalar_lea.hbm %s1258_s8, 4096  ;;  %s945_s4 = scalar_lea.hbm %s1312_s3, 8192 }
 0x17c   : > { %p942_p13 = scmp.ne.s32.totalorder %s1258_s8, %s941_s23  ;;  %p946_p4 = scmp.lt.s32.totalorder %s1258_s8, %s1312_s3 }
 0x17d   : > { %p947_p8 = scmp.lt.s32.totalorder %s945_s4, %s941_s23 }
 0x17e   : > { %p943_p5 = pnand %p942_p13, %p1328_p10 }
 0x17f   : > { %p948_p3 = por %p947_p8, %p946_p4 }
 0x180   : > { %p944_p0 = pneg %p943_p5 }
 0x182   : > { %p949_p11 = pnand %p948_p3, %p944_p0 }
 0x184   : > { %952 = shalt.err (!%p949_p11)
}
 0x185   : > { %s1005_s18 = smov 512   ;;  %s1006_s20 = smov 32  }
 0x186   : > { %784 = dma.vmem_to_hbm [thread:$0]  (%p1328_p10), %s1260_s27, 4096, %s1258_s8, %s644_s16, %s1005_s18, %s1005_s18, %s1006_s20  }
 0x187 PF: > { %s673_s25 = sand.u32 1, %s983_s12   ;;  %p1329_p1 = scmp.ne.s32.totalorder %s1318_s19, 0 }
 0x188   : > { %p1330_p2 = scmp.ge.s32.totalorder %s995_s15, 2  ;;  %s674_s28 = scalar_lea.sflag [#allocation4], %s673_s25 }
 0x18a   : > { %p798_p6 = pnand %p1330_p2, %p1329_p1 }
 0x18c   : > { %p799_p12 = pneg %p798_p6 }
 0x18e   : > { %978 = dma.done.wait (%p799_p12), %s674_s28, 4096  }
 0x18f   : > { %980 = vsyncadd (%p799_p12), %s674_s28, 4294963200  ;;  %p17_p7 = scmp.ge.s32.totalorder %s1099_s7, 4   ;;  %s1331_s12 = smov %s987_s13 }
 0x190   : > { %s1332_s13 = smov %s991_s14  ;;  %s1333_s14 = smov %s1115_s11 }
 0x191   : > { %s1334_s15 = smov %s1099_s7  ;;  %19 = sbr.rel (!%p17_p7) target bundleno = 6 (0x6), region = 85 }
 0x196   :  { %679 = vsyncpa [#allocation3], 1 }
 0x197   :  { %681 = vsyncpa [#allocation3 + $0x1], 1 }
 0x198   :  { %682 = vsyncpa [#allocation6], 1 }
 0x199   :  { %683 = vsyncpa [#allocation4], 1 }
 0x19a   :  { %685 = vsyncpa [#allocation4 + $0x1], 1 }

</bundles_post_ra>
